<compile_context>
chip_gen: v7x
topology: tpu7x:2x2x1
jax: 0.10.0
libtpu: 0.0.40
codegen_flags: <defaults>
</compile_context>

<pallas_src>
import jax
import jax.numpy as jnp
from jax.experimental import pallas as pl
from jax.experimental.pallas import tpu as pltpu


def _round_up(x, m):
    return ((x + m - 1) // m) * m


def _cdiv(a, b):
    return (a + b - 1) // b


# ---------------------------------------------------------------------------
# Kernels
# ---------------------------------------------------------------------------
def _ffm_kernel(x1_ref, x2_ref, w1_ref, w2_ref, b_ref, o_ref):
    """relu(W1 @ x1 + W2 @ x2 + b) on one (C, tile_hw) pixel tile.

    x1/x2: (1, C, thw), w1/w2: (Cout, C), b: (Cout, 1), o: (1, Cout, thw).
    BN is pre-folded into W/b in the wrapper; H*W sits on the lane axis so the
    output stores are lane-dense and no transposes/concat are needed.
    """
    y = jnp.dot(w1_ref[...], x1_ref[0], preferred_element_type=jnp.float32)
    y = y + jnp.dot(w2_ref[...], x2_ref[0], preferred_element_type=jnp.float32)
    y = y + b_ref[...]
    o_ref[0] = jnp.maximum(y, 0.0).astype(o_ref.dtype)


def _ffm_kernel_csplit(x1_ref, x2_ref, w1_ref, w2_ref, b_ref, o_ref, acc_ref):
    """Same math, with the C contraction split across grid axis 2 (arbitrary)."""
    k = pl.program_id(2)

    @pl.when(k == 0)
    def _():
        acc_ref[...] = jnp.zeros_like(acc_ref)

    acc_ref[...] += jnp.dot(w1_ref[...], x1_ref[0],
                            preferred_element_type=jnp.float32)
    acc_ref[...] += jnp.dot(w2_ref[...], x2_ref[0],
                            preferred_element_type=jnp.float32)

    @pl.when(k == pl.num_programs(2) - 1)
    def _():
        o_ref[0] = jnp.maximum(acc_ref[...] + b_ref[...], 0.0).astype(o_ref.dtype)


# ---------------------------------------------------------------------------
# Wrapper
# ---------------------------------------------------------------------------
def _vmem_capacity_bytes():
    try:
        return int(pltpu.get_tpu_info().vmem_capacity_bytes)
    except Exception:
        return 64 * 1024 * 1024   # conservative: v7x per-TensorCore VMEM


def feature_fusion_pallas(conv_feat, trans_feat, params, *, _force_c_chunk=None):
    """conv_feat, trans_feat: (N, C, H, W). Returns (N, Cout, H, W)."""
    N, C, H, W = conv_feat.shape
    C2 = 2 * C
    gamma = params["gamma"]
    beta = params["beta"]
    run_mean = params["running_mean"]
    run_var = params["running_var"]
    eps = params["eps"]
    conv_w = params["conv_w"]
    conv_b = params["conv_b"]
    Cout = conv_w.shape[0]
    dtype = conv_feat.dtype
    itemsize = jnp.dtype(dtype).itemsize

    # ---- Fold eval-mode BN into the 1x1 conv (exact affine algebra) -------
    # out = W @ (scale*x + shift) + b  ==  (W*scale) @ x + (W@shift + b)
    scale = (gamma / jnp.sqrt(run_var + eps)).astype(jnp.float32)      # (2C,)
    shift = (beta - run_mean * scale).astype(jnp.float32)              # (2C,)
    w_mat = conv_w.reshape(Cout, C2).astype(jnp.float32)               # (Cout,2C)
    w_fused = w_mat * scale[None, :]
    b_fused = (conv_b.astype(jnp.float32) + w_mat @ shift).reshape(Cout, 1)
    w1 = w_fused[:, :C].astype(dtype)     # conv_feat half of the concat
    w2 = w_fused[:, C:].astype(dtype)     # trans_feat half of the concat

    # ---- Pixel-major layout: NCHW -> (N, C, H*W) (free reshape) -----------
    HW = H * W
    x1 = conv_feat.reshape(N, C, HW)
    x2 = trans_feat.reshape(N, C, HW)

    # ---- Generation-aware VMEM budget --------------------------------------
    capacity = _vmem_capacity_bytes()
    # ~44 MiB working set on v7x (64 MiB/TC), 64 MiB on v5e/v6e (128 MiB).
    budget = max(24 << 20, min(64 << 20, (capacity * 3) // 4 - (4 << 20)))
    headroom = 4 << 20

    # Sublane/lane-padded byte sizes (what the VMEM buffers actually occupy).
    c_sub = _round_up(C, 8)
    co_sub = _round_up(Cout, 8)
    c_lane = _round_up(C, 128)
    w_half_bytes = co_sub * c_lane * itemsize        # one weight half, padded
    bias_bytes = co_sub * 128 * 4                    # (Cout, 1) f32, padded

    hw_units = _cdiv(HW, 128)     # H*W measured in 128-lane columns
    min_blocks = 4                # keep both v7x TensorCores busy

    # Per 128-lane column: double-buffered x1+x2 in, double-buffered out.
    stream_unit = (2 * 2 * c_sub + 2 * co_sub) * 128 * itemsize
    min_ws = stream_unit + 2 * w_half_bytes + bias_bytes
    use_csplit = (_force_c_chunk is not None) or (min_ws > budget)

    if not use_csplit:
        # ------------------- main path: full C per block -------------------
        # Single-buffer the constant weights/bias when the dead copy matters.
        single_buf_w = (2 * w_half_bytes + bias_bytes) > (1 << 20)
        w_copies = 1 if single_buf_w else 2
        w_footprint = w_copies * (2 * w_half_bytes + bias_bytes)

        max_units = max(1, (budget - w_footprint) // stream_unit)
        num_hw_tiles = _cdiv(hw_units, max_units)
        num_hw_tiles = max(num_hw_tiles, min(hw_units, _cdiv(min_blocks, N)))

        if num_hw_tiles == 1:
            tile_hw = HW                    # full dim: always a legal block
        else:
            tile_hw = _cdiv(hw_units, num_hw_tiles) * 128
        grid_hw = _cdiv(HW, tile_hw)

        tile_lane = _round_up(tile_hw, 128)
        vmem_bytes = (2 * 2 * c_sub * tile_lane * itemsize    # x1, x2 buffers
                      + 2 * co_sub * tile_lane * itemsize     # out buffers
                      + w_footprint + headroom)
        vmem_bytes = int(min(vmem_bytes, capacity))

        if single_buf_w:
            w1_spec = pl.BlockSpec((Cout, C), lambda n, j: (0, 0),
                                   pipeline_mode=pl.Buffered(1))
            w2_spec = pl.BlockSpec((Cout, C), lambda n, j: (0, 0),
                                   pipeline_mode=pl.Buffered(1))
            b_spec = pl.BlockSpec((Cout, 1), lambda n, j: (0, 0),
                                  pipeline_mode=pl.Buffered(1))
        else:
            w1_spec = pl.BlockSpec((Cout, C), lambda n, j: (0, 0))
            w2_spec = pl.BlockSpec((Cout, C), lambda n, j: (0, 0))
            b_spec = pl.BlockSpec((Cout, 1), lambda n, j: (0, 0))

        out = pl.pallas_call(
            _ffm_kernel,
            out_shape=jax.ShapeDtypeStruct((N, Cout, HW), dtype),
            grid_spec=pltpu.PrefetchScalarGridSpec(
                num_scalar_prefetch=0,
                grid=(N, grid_hw),
                in_specs=[
                    pl.BlockSpec((1, C, tile_hw), lambda n, j: (n, 0, j)),
                    pl.BlockSpec((1, C, tile_hw), lambda n, j: (n, 0, j)),
                    w1_spec, w2_spec, b_spec,
                ],
                out_specs=pl.BlockSpec((1, Cout, tile_hw),
                                       lambda n, j: (n, 0, j)),
            ),
            compiler_params=pltpu.CompilerParams(
                dimension_semantics=("parallel", "parallel"),
                vmem_limit_bytes=vmem_bytes),
        )(x1, x2, w1, w2, b_fused)
        return out.reshape(N, Cout, H, W)

    # ---------------- fallback: very large C, split the contraction --------
    if _force_c_chunk is not None:
        c_chunk = int(_force_c_chunk)
    else:
        # Weights are double-buffered along k; x tiles assume a 128-lane tile.
        per_c = (2 * 2 * co_sub * itemsize        # W1+W2 chunk, double-buffered
                 + 2 * 2 * 128 * itemsize)        # x1+x2 chunk, double-buffered
        fixed = (2 * co_sub * 128 * itemsize      # out buffers
                 + co_sub * 128 * 4               # f32 accumulator
                 + 2 * bias_bytes)
        c_chunk = max(128, ((budget - fixed) // per_c) // 128 * 128)
    c_chunk = min(c_chunk, _round_up(C, 128))
    num_k = _cdiv(C, c_chunk)
    c_pad = num_k * c_chunk

    if c_pad != C:
        # Rare path (huge C only): zero-pad the contraction dim so partial
        # chunks are exact (garbage channels would be summed otherwise).
        x1 = jnp.pad(x1, ((0, 0), (0, c_pad - C), (0, 0)))
        x2 = jnp.pad(x2, ((0, 0), (0, c_pad - C), (0, 0)))
        w1 = jnp.pad(w1, ((0, 0), (0, c_pad - C)))
        w2 = jnp.pad(w2, ((0, 0), (0, c_pad - C)))

    w_chunk_bytes = co_sub * c_chunk * itemsize
    stream_unit_k = ((2 * 2 * c_chunk + 2 * co_sub) * 128 * itemsize
                     + co_sub * 128 * 4)
    avail = budget - 2 * (2 * w_chunk_bytes) - 2 * bias_bytes
    max_units = max(1, avail // stream_unit_k)
    num_hw_tiles = _cdiv(hw_units, max_units)
    num_hw_tiles = max(num_hw_tiles, min(hw_units, _cdiv(min_blocks, N)))
    if num_hw_tiles == 1:
        tile_hw = HW
    else:
        tile_hw = _cdiv(hw_units, num_hw_tiles) * 128
    grid_hw = _cdiv(HW, tile_hw)

    tile_lane = _round_up(tile_hw, 128)
    vmem_bytes = (2 * 2 * c_chunk * tile_lane * itemsize
                  + 2 * co_sub * tile_lane * itemsize
                  + co_sub * tile_lane * 4
                  + 2 * (2 * w_chunk_bytes) + 2 * bias_bytes + headroom)
    vmem_bytes = int(min(vmem_bytes, capacity))

    out = pl.pallas_call(
        _ffm_kernel_csplit,
        out_shape=jax.ShapeDtypeStruct((N, Cout, HW), dtype),
        grid_spec=pltpu.PrefetchScalarGridSpec(
            num_scalar_prefetch=0,
            grid=(N, grid_hw, num_k),
            in_specs=[
                pl.BlockSpec((1, c_chunk, tile_hw), lambda n, j, k: (n, k, j)),
                pl.BlockSpec((1, c_chunk, tile_hw), lambda n, j, k: (n, k, j)),
                pl.BlockSpec((Cout, c_chunk), lambda n, j, k: (0, k)),
                pl.BlockSpec((Cout, c_chunk), lambda n, j, k: (0, k)),
                pl.BlockSpec((Cout, 1), lambda n, j, k: (0, 0)),
            ],
            out_specs=pl.BlockSpec((1, Cout, tile_hw),
                                   lambda n, j, k: (n, 0, j)),
            scratch_shapes=[pltpu.VMEM((Cout, tile_hw), jnp.float32)],
        ),
        compiler_params=pltpu.CompilerParams(
            dimension_semantics=("parallel", "parallel", "arbitrary"),
            vmem_limit_bytes=vmem_bytes),
    )(x1, x2, w1, w2, b_fused)
    return out.reshape(N, Cout, H, W)


def init_params(key, in_channels, out_channels):
    C2 = 2 * in_channels
    k1, k2, k3, k4, k5, k6 = jax.random.split(key, 6)
    return {
        # BatchNorm2d(in_channels*2) parameters + running stats
        "gamma": jax.random.uniform(k1, (C2,), jnp.float32, 0.5, 1.5),
        "beta": jax.random.normal(k2, (C2,), jnp.float32) * 0.1,
        "running_mean": jax.random.normal(k3, (C2,), jnp.float32) * 0.1,
        "running_var": jax.random.uniform(k4, (C2,), jnp.float32, 0.5, 1.5),
        "eps": 1e-5,
        # Conv2d(in_channels*2, out_channels, 1)
        "conv_w": jax.random.normal(k5, (out_channels, C2, 1, 1), jnp.float32)
                  * (1.0 / jnp.sqrt(C2)),
        "conv_b": jax.random.normal(k6, (out_channels,), jnp.float32) * 0.1,
    }


if __name__ == "__main__":
    key = jax.random.PRNGKey(0)
    k_in1, k_in2, k_par, k_in3, k_in4, k_par2 = jax.random.split(key, 6)

    def reference(conv_feat, trans_feat, params):
        Cout = params["conv_w"].shape[0]
        C2 = params["conv_w"].shape[1]
        fused = jnp.concatenate([conv_feat, trans_feat], axis=1)
        scale = params["gamma"] / jnp.sqrt(params["running_var"] + params["eps"])
        shift = params["beta"] - params["running_mean"] * scale
        bn = fused * scale[None, :, None, None] + shift[None, :, None, None]
        y = jnp.einsum("nchw,oc->nohw", bn, params["conv_w"].reshape(Cout, C2))
        return jnp.maximum(y + params["conv_b"][None, :, None, None], 0.0)

    # ---- Test 1: main path (full-C blocks, no pad/slice) -------------------
    N, C, H, W, Cout = 2, 4, 16, 16, 4
    conv_feat = jax.random.normal(k_in1, (N, C, H, W), jnp.float32)
    trans_feat = jax.random.normal(k_in2, (N, C, H, W), jnp.float32)
    params = init_params(k_par, C, Cout)
    out = feature_fusion_pallas(conv_feat, trans_feat, params)
    jax.block_until_ready(out)
    ref = reference(conv_feat, trans_feat, params)
    assert out.shape == ref.shape
    assert jnp.allclose(out, ref, atol=1e-3, rtol=1e-3), "mismatch (main path)"

    # ---- Test 2: large-C fallback (C split over an 'arbitrary' axis) -------
    N2, Cbig, H2, W2, Cout2 = 1, 256, 8, 8, 8
    conv_feat2 = jax.random.normal(k_in3, (N2, Cbig, H2, W2), jnp.float32)
    trans_feat2 = jax.random.normal(k_in4, (N2, Cbig, H2, W2), jnp.float32)
    params2 = init_params(k_par2, Cbig, Cout2)
    out2 = feature_fusion_pallas(conv_feat2, trans_feat2, params2,
                                 _force_c_chunk=128)
    jax.block_until_ready(out2)
    ref2 = reference(conv_feat2, trans_feat2, params2)
    assert jnp.allclose(out2, ref2, atol=2e-3, rtol=2e-3), "mismatch (c-split)"

    print("KERNEL_OK")
</pallas_src>

<mosaic_0001>
module attributes {stable_mosaic.version = 11 : i64} {
  func.func @_ffm_kernel(%arg0: i32, %arg1: i32, %arg2: memref<1x4x128xf32, #tpu.memory_space<vmem>>, %arg3: memref<1x4x128xf32, #tpu.memory_space<vmem>>, %arg4: memref<4x4xf32, #tpu.memory_space<vmem>>, %arg5: memref<4x4xf32, #tpu.memory_space<vmem>>, %arg6: memref<4x1xf32, #tpu.memory_space<vmem>>, %arg7: memref<1x4x128xf32, #tpu.memory_space<vmem>>) attributes {dimension_semantics = [#tpu.dimension_semantics<parallel>, #tpu.dimension_semantics<parallel>], iteration_bounds = array<i64: 2, 2>, scalar_prefetch = 0 : i64, scratch_operands = 0 : i64, tpu.core_type = #tpu.core_type<tc>, window_params = [{transform_indices = @transform_0, window_bounds = array<i64: 1, 4, 128>}, {transform_indices = @transform_1, window_bounds = array<i64: 1, 4, 128>}, {pipeline_mode = #tpu.pipeline_mode<synchronous>, transform_indices = @transform_2, window_bounds = array<i64: 4, 4>}, {pipeline_mode = #tpu.pipeline_mode<synchronous>, transform_indices = @transform_3, window_bounds = array<i64: 4, 4>}, {pipeline_mode = #tpu.pipeline_mode<synchronous>, transform_indices = @transform_4, window_bounds = array<i64: 4, 1>}, {transform_indices = @transform_5, window_bounds = array<i64: 1, 4, 128>}]} {
    %c0 = arith.constant 0 : index
    %c0_0 = arith.constant 0 : index
    %0 = vector.load %arg4[%c0, %c0_0] : memref<4x4xf32, #tpu.memory_space<vmem>>, vector<4x4xf32>
    %c0_1 = arith.constant 0 : index
    %c0_2 = arith.constant 0 : index
    %c0_3 = arith.constant 0 : index
    %1 = vector.load %arg2[%c0_1, %c0_2, %c0_3] : memref<1x4x128xf32, #tpu.memory_space<vmem>>, vector<1x4x128xf32>
    %2 = vector.shape_cast %1 : vector<1x4x128xf32> to vector<4x128xf32>
    %cst = arith.constant dense<0.000000e+00> : vector<4x128xf32>
    %3 = tpu.matmul %0, %2, %cst {dimension_numbers = #tpu.dot_dimension_numbers<[1], [0], [0], [1], [0, 0, 1, 1], [], []>} : vector<4x4xf32>, vector<4x128xf32>, vector<4x128xf32> -> vector<4x128xf32>
    %c0_4 = arith.constant 0 : index
    %c0_5 = arith.constant 0 : index
    %4 = vector.load %arg5[%c0_4, %c0_5] : memref<4x4xf32, #tpu.memory_space<vmem>>, vector<4x4xf32>
    %c0_6 = arith.constant 0 : index
    %c0_7 = arith.constant 0 : index
    %c0_8 = arith.constant 0 : index
    %5 = vector.load %arg3[%c0_6, %c0_7, %c0_8] : memref<1x4x128xf32, #tpu.memory_space<vmem>>, vector<1x4x128xf32>
    %6 = vector.shape_cast %5 : vector<1x4x128xf32> to vector<4x128xf32>
    %cst_9 = arith.constant dense<0.000000e+00> : vector<4x128xf32>
    %7 = tpu.matmul %4, %6, %cst_9 {dimension_numbers = #tpu.dot_dimension_numbers<[1], [0], [0], [1], [0, 0, 1, 1], [], []>} : vector<4x4xf32>, vector<4x128xf32>, vector<4x128xf32> -> vector<4x128xf32>
    %8 = arith.addf %3, %7 : vector<4x128xf32>
    %c0_10 = arith.constant 0 : index
    %c0_11 = arith.constant 0 : index
    %9 = vector.load %arg6[%c0_10, %c0_11] : memref<4x1xf32, #tpu.memory_space<vmem>>, vector<4x1xf32>
    %10 = vector.broadcast %9 : vector<4x1xf32> to vector<4x128xf32>
    %11 = arith.addf %8, %10 : vector<4x128xf32>
    %cst_12 = arith.constant 0.000000e+00 : f32
    %12 = vector.broadcast %cst_12 : f32 to vector<4x128xf32>
    %13 = arith.maximumf %11, %12 : vector<4x128xf32>
    %c0_13 = arith.constant 0 : index
    %c0_14 = arith.constant 0 : index
    %c0_15 = arith.constant 0 : index
    %14 = vector.load %arg7[%c0_13, %c0_14, %c0_15] : memref<1x4x128xf32, #tpu.memory_space<vmem>>, vector<1x4x128xf32>
    %15 = vector.shape_cast %14 : vector<1x4x128xf32> to vector<4x128xf32>
    %16 = vector.shape_cast %13 : vector<4x128xf32> to vector<1x4x128xf32>
    tpu.vector_store %arg7[%c0_13, %c0_14, %c0_15], %16 {strides = array<i32>} : memref<1x4x128xf32, #tpu.memory_space<vmem>>, vector<1x4x128xf32>,
    return
  }
  func.func @transform_0(%arg0: i32, %arg1: i32) -> (i32, i32, i32) {
    %c0_i32 = arith.constant 0 : i32
    %c0_i32_0 = arith.constant 0 : i32
    return %arg0, %c0_i32, %arg1 : i32, i32, i32
  }
  func.func @transform_1(%arg0: i32, %arg1: i32) -> (i32, i32, i32) {
    %c0_i32 = arith.constant 0 : i32
    %c0_i32_0 = arith.constant 0 : i32
    return %arg0, %c0_i32, %arg1 : i32, i32, i32
  }
  func.func @transform_2(%arg0: i32, %arg1: i32) -> (i32, i32) {
    %c0_i32 = arith.constant 0 : i32
    %c0_i32_0 = arith.constant 0 : i32
    %c0_i32_1 = arith.constant 0 : i32
    return %c0_i32, %c0_i32_0 : i32, i32
  }
  func.func @transform_3(%arg0: i32, %arg1: i32) -> (i32, i32) {
    %c0_i32 = arith.constant 0 : i32
    %c0_i32_0 = arith.constant 0 : i32
    %c0_i32_1 = arith.constant 0 : i32
    return %c0_i32, %c0_i32_0 : i32, i32
  }
  func.func @transform_4(%arg0: i32, %arg1: i32) -> (i32, i32) {
    %c0_i32 = arith.constant 0 : i32
    %c0_i32_0 = arith.constant 0 : i32
    %c0_i32_1 = arith.constant 0 : i32
    return %c0_i32, %c0_i32_0 : i32, i32
  }
  func.func @transform_5(%arg0: i32, %arg1: i32) -> (i32, i32, i32) {
    %c0_i32 = arith.constant 0 : i32
    %c0_i32_0 = arith.constant 0 : i32
    return %arg0, %c0_i32, %arg1 : i32, i32, i32
  }
}

</mosaic_0001>

<bundles_post_ra>
// kernel: tpu_custom_call.1
= control target key start
LH: loop header
LB: loop body
LE: loop exit
PB: predicated region body
PF: predicated region fallthrough
CT: control target
= control target key end

     0   :  { %s1175_s0 = inlined_call_operand.hbm [shape: f32[2,4,256], index: 0, kind: input, shape index: {}]   ;;  %s1176_s1 = inlined_call_operand.hbm [shape: f32[2,4,256], index: 1, kind: input, shape index: {}]   ;;  %s1177_s2 = inlined_call_operand.vmem [shape: f32[4,4], index: 2, kind: input, shape index: {}]   ;;  %s1178_s3 = inlined_call_operand.vmem [shape: f32[4,4], index: 3, kind: input, shape index: {}]   ;;  %s1179_s4 = inlined_call_operand.vmem [shape: f32[4,1], index: 4, kind: input, shape index: {}]   ;;  %s1180_s5 = inlined_call_operand.hbm [shape: f32[2,4,256], index: 5, kind: output, shape index: {}]  }
   0x1   :  { %1187 = sst [smem:[#allocation13_spill]] %s1175_s0 }
   0x2   :  { %10 = vsyncpa [#allocation3], 0 }
   0x3   :  { %12 = vsyncpa [#allocation3 + $0x1], 0 }
   0x4   :  { %13 = vsyncpa [#allocation6], 0 }
   0x5   :  { %15 = vsyncpa [#allocation6 + $0x1], 0 }
   0x6   :  { %16 = vsyncpa [#allocation4], 0 }
   0x7   :  { %18 = vsyncpa [#allocation4 + $0x1], 0  ;;  %s916_s18 = smov 0   ;;  %s918_s19 = smov 0  }
   0x8   :  { %s920_s20 = smov 0   ;;  %s922_s21 = smov 0  }
   0x9   :  { %s924_s22 = smov 0   ;;  %s926_s23 = smov 0  }
   0xa   :  { %s928_s24 = smov 0   ;;  %s930_s25 = smov 0  }
   0xb LB: > { %s592_s26 = sadd.s32 4294967295, %s878_s25   ;;  %s593_s27 = sadd.s32 4294967294, %s878_s25   ;;  %s878_s25 = sphi %s930_s25, %s24_s25   ;;  %s874_s24 = sphi %s928_s24, %s1213_s24   ;;  %s870_s23 = sphi %s926_s23, %s1212_s23   ;;  %s866_s22 = sphi %s924_s22, %s1211_s22   ;;  %s862_s21 = sphi %s922_s21, %s1210_s21   ;;  %s858_s20 = sphi %s920_s20, %s1209_s20   ;;  %s854_s19 = sphi %s918_s19, %s1208_s19   ;;  %s850_s18 = sphi %s916_s18, %s1207_s18  }
   0xc   : > { %s33_s28 = sadd.s32 1, %s870_s23  ;;  %s36_s29 = sadd.s32 1, %s874_s24 }
   0xd   : > { %p34_p0 = scmp.ge.s32.totalorder %s33_s28, 2  ;;  %s45_s30 = sadd.s32 1, %s858_s20 }
   0xe   : > { %p52_p1 = scmp.ne.s32.totalorder %s858_s20, %s854_s19  ;;  %p53_p2 = scmp.eq.s32.totalorder %s878_s25, 0 }
   0xf   : > { %s1215_s28 = smov (%p34_p0, %s33_s28), 0  ;;  %s1217_s29 = smov (!%p34_p0, %s36_s29), %s874_s24 }
  0x10   : > { %1188 = sst [smem:[#allocation11_spill]] %s1215_s28  ;;  %s41_s6 = ssub.s32 %s870_s23, %s1215_s28 }
  0x11   : > { %p969_p3 = por %p53_p2, %p52_p1  ;;  %p38_p4 = scmp.ge.s32.totalorder %s1217_s29, 2 }
  0x12   : > { %p58_p5 = scmp.ne.s32.totalorder %s854_s19, %s850_s18  ;;  %p59_p6 = scmp.eq.s32.totalorder %s592_s26, 0 }
  0x13   : > { %p175_p7 = scmp.eq.s32.totalorder %s592_s26, 3  ;;  %s1219_s29 = smov (%p38_p4, %s1217_s29), 0 }
  0x14   : > { %1190 = sst [smem:[#allocation12_spill]] %s1219_s29  ;;  %p977_p8 = por %p59_p6, %p58_p5 }
  0x15   : > { %p981_p9 = por %p175_p7, %p52_p1  ;;  %s40_s10 = ssub.s32 %s874_s24, %s1219_s29 }
  0x16   : > { %s1191_s8 = scalar_select %p977_p8, 1, 0 }
  0x17   : > { %s1192_s9 = scalar_select %p981_p9, 1, 0 }
  0x18   : > { %p181_p10 = scmp.eq.s32.totalorder %s593_s27, 3  ;;  %s42_s11 = sor.u32 %s41_s6, %s40_s10 }
  0x19   : > { %p43_p11 = scmp.eq.s32.totalorder %s42_s11, 0  ;;  %p646_p13 = scmp.lt.s32.totalorder %s878_s25, 4 }
  0x1a   : > { %p987_p12 = por %p181_p10, %p58_p5  ;;  %s993_s13 = sand.u32 1, %s858_s20  }
  0x1b   : > { %s996_s14 = scalar_select %p43_p11, %s858_s20, %s45_s30  }
  0x1c   : > { %s1193_s12 = scalar_select %p987_p12, 1, 0 }
  0x1d   : > { %s1182_s15 = sshll.u32 %s993_s13, 2  ;;  %s597_s16 = sshll.u32 %s874_s24, 1 }
  0x1e   : > { %s1001_s17 = sadd.s32 %s870_s23, %s597_s16  ;;  %s214_s26 = scalar_lea.vmem [#allocation2], %s1182_s15 }
  0x1f   : > { %s223_s27 = sshll.u32 %s214_s26, 4  ;;  %s1183_s6 = sshll.u32 %s1001_s17, 6  ;;  %s1006_s27 = int_to_ptr.vmem [resolvable:$true] %s223_s27 }
  0x20   : > { %s1194_s0 = sld [smem:[#allocation13_spill]]  ;;  %p1017_p0 = pnand %p646_p13, %p969_p3 }
  0x21   : > { %s211_s16 = scalar_lea.sflag [#allocation3], %s993_s13 }
  0x22   : > { %p718_p5 = pneg %p1017_p0 }
  0x26   : > { %s1013_s29 = scalar_lea.hbm %s1194_s0, %s1183_s6  ;;  %s721_s11 = scalar_lea.hbm %s1194_s0, 256 }
  0x27   : > { %s716_s26 = scalar_lea.hbm %s1013_s29, 64  ;;  %p722_p3 = scmp.lt.u32.totalorder %s1013_s29, %s1194_s0 }
  0x28   : > { %p717_p4 = scmp.ne.s32.totalorder %s1013_s29, %s716_s26  ;;  %p723_p10 = scmp.lt.u32.totalorder %s721_s11, %s716_s26 }
  0x29   : > { %p725_p13 = scmp.lt.u32.totalorder %s716_s26, %s1013_s29 }
  0x2a   : > { %p719_p6 = pnand %p718_p5, %p717_p4  ;;  %p724_p11 = por %p723_p10, %p722_p3 }
  0x2c   : > { %p720_p7 = pneg %p719_p6  ;;  %p726_p1 = por %p725_p13, %p724_p11 }
  0x2e   : > { %p727_p2 = pnand %p726_p1, %p720_p7 }
  0x30   : > { %730 = shalt.err (!%p727_p2)
}
  0x31   : > { %s731_s28 = scalar_lea.vmem %s1006_s27, 64  ;;  %s880_s7 = smov [#allocation2]  }
  0x32   : > { %p732_p4 = scmp.ne.s32.totalorder %s1006_s27, %s731_s28  ;;  %s736_s10 = sshll.u32 %s880_s7, 4  ;;  %s737_s10 = int_to_ptr.vmem [resolvable:$false] %s736_s10 }
  0x33   : > { %s738_s15 = scalar_lea.vmem %s737_s10, 128  ;;  %p739_p9 = scmp.lt.s32.totalorder %s1006_s27, %s737_s10 }
  0x34   : > { %p734_p6 = pnand %p732_p4, %p718_p5  ;;  %p740_p3 = scmp.lt.s32.totalorder %s738_s15, %s731_s28 }
  0x36   : > { %p735_p12 = pneg %p734_p6  ;;  %p741_p10 = por %p740_p3, %p739_p9 }
  0x38   : > { %p742_p11 = pnand %p741_p10, %p735_p12 }
  0x3a   : > { %745 = shalt.err (!%p742_p11)
}
  0x3b   : > { %638 = dma.hbm_to_vmem [thread:$0]  (!%p1017_p0), %s1013_s29, 64, %s1006_s27, %s211_s16  }
  0x3c   : > { %p1196_p1 = scmp.lt.s32.totalorder %s878_s25, 5  ;;  %p1197_p2 = scmp.ge.s32.totalorder %s878_s25, 1 }
  0x3d   : > { %s1199_s28 = sshll.u32 %s1001_s17, 6  ;;  %s1200_s10 = sshll.u32 %s993_s13, 2 }
  0x3e   : > { %p1053_p7 = pnand %p1197_p2, %p1196_p1  ;;  %s1062_s7 = scalar_lea.hbm %s1176_s1, %s1199_s28 }
  0x3f   : > { %s234_s15 = scalar_lea.vmem [#allocation5], %s1200_s10  ;;  %s231_s29 = scalar_lea.sflag [#allocation6], %s993_s13 }
  0x40   : > { %s1198_s6 = scalar_select %p1053_p7, 1, 0 }
  0x41   : > { %s243_s0 = sshll.u32 %s234_s15, 4  ;;  %s746_s27 = scalar_lea.hbm %s1062_s7, 64  ;;  %s244_s0 = int_to_ptr.vmem [resolvable:$true] %s243_s0 }
  0x42   : > { %p747_p9 = scmp.ne.s32.totalorder %s1062_s7, %s746_s27  ;;  %s751_s28 = scalar_lea.hbm %s1176_s1, 256 }
  0x43   : > { %p752_p4 = scmp.lt.u32.totalorder %s1062_s7, %s1176_s1  ;;  %p753_p6 = scmp.lt.u32.totalorder %s751_s28, %s746_s27 }
  0x44   : > { %p749_p12 = pnand %p747_p9, %p718_p5  ;;  %p755_p10 = scmp.lt.u32.totalorder %s746_s27, %s1062_s7 }
  0x45   : > { %p754_p3 = por %p753_p6, %p752_p4 }
  0x46   : > { %p750_p13 = pneg %p749_p12 }
  0x47   : > { %p756_p11 = por %p755_p10, %p754_p3 }
  0x49   : > { %p757_p1 = pnand %p756_p11, %p750_p13 }
  0x4b   : > { %760 = shalt.err (!%p757_p1)
}
  0x4c   : > { %s761_s13 = scalar_lea.vmem %s244_s0, 64  ;;  %s881_s10 = smov [#allocation5]  }
  0x4d   : > { %p762_p2 = scmp.ne.s32.totalorder %s244_s0, %s761_s13  ;;  %s766_s15 = sshll.u32 %s881_s10, 4  ;;  %s767_s15 = int_to_ptr.vmem [resolvable:$false] %s766_s15 }
  0x4e   : > { %s768_s17 = scalar_lea.vmem %s767_s15, 128  ;;  %p769_p8 = scmp.lt.s32.totalorder %s244_s0, %s767_s15 }
  0x4f   : > { %p764_p9 = pnand %p762_p2, %p718_p5  ;;  %p770_p7 = scmp.lt.s32.totalorder %s768_s17, %s761_s13 }
  0x51   : > { %p765_p12 = pneg %p764_p9  ;;  %p771_p4 = por %p770_p7, %p769_p8 }
  0x53   : > { %p772_p6 = pnand %p771_p4, %p765_p12 }
  0x55   : > { %775 = shalt.err (!%p772_p6)
}
  0x56   : > { %641 = dma.hbm_to_vmem [thread:$0]  (!%p1017_p0), %s1062_s7, 64, %s244_s0, %s231_s29  }
  0x57   : > { %p1201_p13 = scmp.ne.s32.totalorder %s1198_s6, 0 }
  0x58   : > { %s1089_s27 = sand.u32 (!%p1201_p13), 1, %s854_s19   ;;  %p1202_p8 = scmp.ne.s32.totalorder (!%p1201_p13), %s1191_s8, 0 }
  0x59   : > { %252 = sbr.rel (%p1201_p13) target bundleno = 336 (0x150), region = 40  ;;  %s1092_s16 = sshll.u32 (!%p1201_p13), %s1089_s27, 2 }
  0x5a   : > { %s255_s28 = scalar_lea.sflag (!%p1201_p13), [#allocation3], %s1089_s27  ;;  %s258_s26 = scalar_lea.vmem (!%p1201_p13), [#allocation2], %s1092_s16 }
  0x60   : > { %837 = dma.done.wait (%p1202_p8), %s255_s28, 64  }
  0x61   : > { %839 = vsyncadd (%p1202_p8), %s255_s28, 4294967232  ;;  %s264_s0 = scalar_lea.sflag [#allocation6], %s1089_s27  ;;  %s267_s30 = scalar_lea.vmem [#allocation5], %s1092_s16 }
  0x62   : > { %841 = dma.done.wait (%p1202_p8), %s264_s0, 64  }
  0x63   : > { %843 = vsyncadd (%p1202_p8), %s264_s0, 4294967232  ;;  %v882_v0 = vmov 0.0   ;;  %vm883_vm0 = vmmov 0   ;;  %v884_v1 = vmov 0   ;;  %vm307_vm1 = vcmask 1043456   ;;  %s611_s10 = sshll.u32 %s866_s22, 1 }
  0x64   : > { %619 = vmatprep.subr.mxu0 %v882_v0  ;;  %624 = vmatprep.subr.mxu1 %v882_v0  ;;  %vm303_vm2 = vcmask 31744   ;;  %v302_v2 = vld [vmem:[%s267_s30] sm:$0xf]  ;;  %v300_v3 = vld [vmem:[%s258_s26] sm:$0xf]  ;;  %s478_s15 = sadd.s32 %s862_s21, %s611_s10  ;;  %s298_s28 = scalar_lea.vmem [#allocation7], %s1092_s16 }
  0x65   : > { %621 = vmatprep.mubr.msk.f32.mxu0 %vm883_vm0, %v882_v0  ;;  %626 = vmatprep.mubr.msk.f32.mxu1 %vm883_vm0, %v882_v0  ;;  %v301_v4 = vld [vmem:[%s1178_s3] sm:$0xf]  ;;  %s612_s17 = sshll.u32 %s478_s15, 6  ;;  %s482_s26 = sshll.u32 %s298_s28, 4  ;;  %s1123_s26 = int_to_ptr.vmem [resolvable:$true] %s482_s26 }
  0x66   : > { %715 = vset.pattern.permute.xlu0 %v884_v1  ;;  %620 = vmatpush3.msk.msra.mxu0 %vm307_vm1, %v302_v2  ;;  %v299_v5 = vld [vmem:[%s1177_s2] sm:$0xf]  ;;  %s1121_s6 = scalar_lea.hbm %s1180_s5, %s612_s17  ;;  %s467_s21 = scalar_lea.sflag [#allocation4], %s1089_s27 }
  0x67   : > { %625 = vmatpush3.msk.msra.mxu1 %vm307_vm1, %v300_v3  ;;  %v457_v6 = vld [vmem:[%s1179_s4] sm:$0xf]  ;;  %622 = vmatmul.mubr.msk.f32.vlgmr.msra.gmra.mrb[0].mxu0 %vm303_vm2, %v301_v4  ;;  %s776_s22 = scalar_lea.vmem %s1123_s26, 64  ;;  %p1203_p5 = scmp.ne.s32.totalorder %s1192_s9, 0 }
  0x68   : > { %627 = vmatmul.mubr.msk.f32.vlgmr.msra.gmra.mrb[0].mxu1 %vm303_vm2, %v299_v5  ;;  %460 = vperm.xlu0 %715, %v457_v6   ;;  %p777_p0 = scmp.ne.s32.totalorder %s1123_s26, %s776_s22  ;;  %s885_s16 = smov [#allocation7]  }
  0x69   : > { %s780_s7 = sshll.u32 %s885_s16, 4  ;;  %s781_s7 = int_to_ptr.vmem [resolvable:$false] %s780_s7 }
  0x6a   : > { %p778_p7 = pnand %p777_p0, %p1203_p5  ;;  %s782_s8 = scalar_lea.vmem %s781_s7, 128 }
  0x6b   : > { %p783_p10 = scmp.lt.s32.totalorder %s1123_s26, %s781_s7  ;;  %p784_p11 = scmp.lt.s32.totalorder %s782_s8, %s776_s22 }
  0x6c   : > { %p779_p3 = pneg %p778_p7 }
  0x6d   : > { %p785_p1 = por %p784_p11, %p783_p10 }
  0x6f   : > { %p786_p2 = pnand %p785_p1, %p779_p3 }
  0xe7   : > { %v461_v7 = vpop.permute.xlu0 %460 }
 0x13a   : > { %v377_v8 = vpop.f32.mrb[0].mxu0 }
 0x13b   : > { %v453_v9 = vpop.f32.mrb[0].mxu1  ;;  %v623_v11 = vpop.f32.mrb[1].mxu0 }
 0x13c   : > { %v454_v10 = vadd.f32 %v453_v9, %v377_v8  ;;  %v628_v12 = vpop.f32.mrb[1].mxu1 }
 0x13e   : > { %v463_v13 = vadd.f32 %v461_v7, %v454_v10 }
 0x140   : > { %v464_v14 = vmax.f32 %v463_v13, 0.0 }
 0x142   : > { %465 = vst [vmem:[%s298_s28] sm:$0xf] %v464_v14 }
 0x143   : > { %789 = shalt.err (!%p786_p2)
}
 0x144   : > { %s790_s27 = scalar_lea.hbm %s1121_s6, 64  ;;  %s794_s13 = scalar_lea.hbm %s1180_s5, 256 }
 0x145   : > { %p791_p9 = scmp.ne.s32.totalorder %s1121_s6, %s790_s27  ;;  %p795_p6 = scmp.lt.u32.totalorder %s1121_s6, %s1180_s5 }
 0x146   : > { %p796_p13 = scmp.lt.u32.totalorder %s794_s13, %s790_s27  ;;  %p798_p0 = scmp.lt.u32.totalorder %s790_s27, %s1121_s6 }
 0x147   : > { %p792_p12 = pnand %p791_p9, %p1203_p5 }
 0x148   : > { %p797_p8 = por %p796_p13, %p795_p6 }
 0x149   : > { %p793_p4 = pneg %p792_p12 }
 0x14a   : > { %p799_p7 = por %p798_p0, %p797_p8 }
 0x14c   : > { %p800_p3 = pnand %p799_p7, %p793_p4 }
 0x14e   : > { %803 = shalt.err (!%p800_p3)
}
 0x14f   : > { %633 = dma.vmem_to_hbm [thread:$0]  (%p1203_p5), %s1123_s26, 64, %s1121_s6, %s467_s21  }
 0x150 PF: > { %p647_p10 = scmp.ge.s32.totalorder %s878_s25, 2  ;;  %s494_s17 = sand.u32 1, %s850_s18  }
 0x151   : > { %p1204_p11 = scmp.ne.s32.totalorder %s1193_s12, 0  ;;  %s495_s28 = scalar_lea.sflag [#allocation4], %s494_s17 }
 0x153   : > { %p643_p1 = pnand %p647_p10, %p1204_p11 }
 0x155   : > { %845 = dma.done.wait (!%p643_p1), %s495_s28, 64  }
 0x156   : > { %847 = vsyncadd (!%p643_p1), %s495_s28, 4294967232  ;;  %s24_s25 = sadd.s32 1, %s878_s25   ;;  %s1205_s9 = sld [smem:[#allocation11_spill]] }
 0x157   : > { %p21_p2 = scmp.ge.s32.totalorder %s24_s25, 6   ;;  %s1206_s26 = sld [smem:[#allocation12_spill]] }
 0x158   : > { %s1207_s18 = smov %s854_s19  ;;  %s1208_s19 = smov %s858_s20 }
 0x159   : > { %s1209_s20 = smov %s996_s14  ;;  %s1210_s21 = smov %s870_s23 }
 0x15a   : > { %s1211_s22 = smov %s874_s24  ;;  %23 = sbr.rel (!%p21_p2) target bundleno = 11 (0xb), region = 98 }
 0x15c   : > { %s1212_s23 = smov %s1205_s9 }
 0x15d   : > { %s1213_s24 = smov %s1206_s26 }
 0x161   :  { %500 = vsyncpa [#allocation3], 1 }
 0x162   :  { %502 = vsyncpa [#allocation3 + $0x1], 1 }
 0x163   :  { %503 = vsyncpa [#allocation6], 1 }
 0x164   :  { %505 = vsyncpa [#allocation6 + $0x1], 1 }
 0x165   :  { %506 = vsyncpa [#allocation4], 1 }
 0x166   :  { %508 = vsyncpa [#allocation4 + $0x1], 1 }

</bundles_post_ra>
